<compile_context>
chip_gen: v7x
topology: tpu7x:2x2x1
jax: 0.10.0
libtpu: 0.0.40
codegen_flags: <defaults>
</compile_context>

<pallas_src>
import functools
import math

import jax
import jax.numpy as jnp
from jax.experimental import pallas as pl
from jax.experimental.pallas import tpu as pltpu

LANE = 128
_VMEM_LIMIT = 48 * 1024 * 1024             # safe on v5e/v6e (128 MiB) and v7x (64 MiB)
_XW_RESIDENT_MAX_BYTES = 12 * 1024 * 1024  # resident XW slab budget (x2 for buffers)


def _round_up(x, m):
    return ((x + m - 1) // m) * m


def _largest_tile(n_pad, candidates):
    """Largest candidate that divides n_pad (n_pad is always a multiple of 128)."""
    for t in candidates:
        if t <= n_pad and n_pad % t == 0:
            return t
    return n_pad


def _pick_dst_tile(n_pad):
    """Dst-row tile: prefer >=4 dst tiles so the 'parallel' dst axis can be
    sharded across both v7x TensorCores; fall back on small graphs."""
    for min_tiles in (4, 2, 1):
        for t in (512, 256, 128):
            if n_pad % t == 0 and n_pad // t >= min_tiles:
                return t
    return 128


# ---------------------------------------------------------------------------
# Kernel 1: feature transform  XW = h @ W_h + PW   (row-tiled, lane-dense out)
# ---------------------------------------------------------------------------
def _xw_kernel(h_ref, w_ref, pw_ref, o_ref):
    acc = jnp.dot(h_ref[...], w_ref[...], preferred_element_type=jnp.float32)
    o_ref[...] = (acc + pw_ref[...].astype(jnp.float32)).astype(o_ref.dtype)


def _feature_transform(h_pad, w_pad, pw_pad, *, row_tile):
    n_pad, f_in_pad = h_pad.shape
    f_out_pad = w_pad.shape[1]
    return pl.pallas_call(
        _xw_kernel,
        out_shape=jax.ShapeDtypeStruct((n_pad, f_out_pad), jnp.bfloat16),
        grid_spec=pltpu.PrefetchScalarGridSpec(
            num_scalar_prefetch=0,
            grid=(n_pad // row_tile,),
            in_specs=[
                pl.BlockSpec((row_tile, f_in_pad), lambda i: (i, 0)),
                pl.BlockSpec((f_in_pad, f_out_pad), lambda i: (0, 0)),
                pl.BlockSpec((row_tile, f_out_pad), lambda i: (i, 0)),
            ],
            out_specs=pl.BlockSpec((row_tile, f_out_pad), lambda i: (i, 0)),
        ),
        compiler_params=pltpu.CompilerParams(
            dimension_semantics=("parallel",),
            vmem_limit_bytes=_VMEM_LIMIT,
        ),
        cost_estimate=pl.CostEstimate(
            flops=2 * n_pad * f_in_pad * f_out_pad,
            transcendentals=0,
            bytes_accessed=(n_pad * f_in_pad * 2
                            + f_in_pad * f_out_pad * 2
                            + 2 * n_pad * f_out_pad * 2),
        ),
    )(h_pad, w_pad, pw_pad)


# ---------------------------------------------------------------------------
# Kernel 2: tiled neighbor aggregation  H = A_hat @ XW + b  (+ optional ReLU)
# ---------------------------------------------------------------------------
def _agg_kernel(a_ref, xw_ref, b_ref, o_ref, acc_ref, *, apply_relu, xw_resident, tk):
    k = pl.program_id(1)

    @pl.when(k == 0)
    def _():
        acc_ref[...] = jnp.zeros_like(acc_ref)

    if xw_resident:
        # XW lives whole in VMEM (DMA'd once); slice the src chunk in-kernel.
        start = pl.multiple_of(k * tk, tk)
        xw_blk = xw_ref[pl.ds(start, tk), :]
    else:
        xw_blk = xw_ref[...]

    acc_ref[...] += jnp.dot(a_ref[...], xw_blk, preferred_element_type=jnp.float32)

    @pl.when(k == pl.num_programs(1) - 1)
    def _():
        h = acc_ref[...] + b_ref[...]
        if apply_relu:
            h = jnp.maximum(h, 0.0)
        o_ref[...] = h.astype(o_ref.dtype)


def _aggregate(a_hat_pad, xw_pad, b_pad, *, apply_relu, out_dtype, tm, tk):
    n_pad = a_hat_pad.shape[0]
    f_out_pad = xw_pad.shape[1]
    n_dst_tiles = n_pad // tm
    n_src_tiles = n_pad // tk

    # Keep XW fully VMEM-resident (single DMA) when the slab is small enough;
    # otherwise re-stream it per dst tile like before.
    xw_resident = n_pad * f_out_pad * 2 <= _XW_RESIDENT_MAX_BYTES
    if xw_resident:
        xw_spec = pl.BlockSpec((n_pad, f_out_pad), lambda i, k: (0, 0))
        xw_reads = 1
    else:
        xw_spec = pl.BlockSpec((tk, f_out_pad), lambda i, k: (k, 0))
        xw_reads = n_dst_tiles

    kernel = functools.partial(_agg_kernel, apply_relu=apply_relu,
                               xw_resident=xw_resident, tk=tk)
    out_itemsize = jnp.dtype(out_dtype).itemsize
    bytes_accessed = (n_pad * n_pad * 2
                      + n_pad * f_out_pad * 2 * xw_reads
                      + n_pad * f_out_pad * out_itemsize)

    return pl.pallas_call(
        kernel,
        out_shape=jax.ShapeDtypeStruct((n_pad, f_out_pad), out_dtype),
        grid_spec=pltpu.PrefetchScalarGridSpec(
            num_scalar_prefetch=0,
            grid=(n_dst_tiles, n_src_tiles),
            in_specs=[
                pl.BlockSpec((tm, tk), lambda i, k: (i, k)),
                xw_spec,
                pl.BlockSpec((1, f_out_pad), lambda i, k: (0, 0)),
            ],
            out_specs=pl.BlockSpec((tm, f_out_pad), lambda i, k: (i, 0)),
            scratch_shapes=[pltpu.VMEM((tm, f_out_pad), jnp.float32)],
        ),
        compiler_params=pltpu.CompilerParams(
            dimension_semantics=("parallel", "arbitrary"),
            vmem_limit_bytes=_VMEM_LIMIT,
        ),
        cost_estimate=pl.CostEstimate(
            flops=2 * n_pad * n_pad * f_out_pad,
            transcendentals=0,
            bytes_accessed=bytes_accessed,
        ),
    )(a_hat_pad, xw_pad, b_pad)


def gcn_layer(h_pad, w_h_pad, pw_pad, b_pad, a_hat_pad, *, apply_relu, out_dtype,
              row_tile, tm, tk):
    """One GCN layer: act?(A_hat @ (h @ W_h + PW) + b), norm folded into A_hat."""
    xw = _feature_transform(h_pad, w_h_pad, pw_pad, row_tile=row_tile)
    return _aggregate(a_hat_pad, xw, b_pad, apply_relu=apply_relu,
                      out_dtype=out_dtype, tm=tm, tk=tk)


# ---------------------------------------------------------------------------
# PGCN forward (embedding lookup / W split / padding are plain-JAX glue)
# ---------------------------------------------------------------------------
def init_pgcn_params(key, in_dim, hidden_dim, out_dim, pos_dim, num_layers,
                     position_vocab_size=3):
    """Deterministic init mirroring the PyTorch module's shapes."""
    dims_in = [in_dim + pos_dim] + [hidden_dim + pos_dim] * num_layers
    dims_out = [hidden_dim] * num_layers + [out_dim]
    params = {"layers": [], "pos_emb": []}
    for fi, fo in zip(dims_in, dims_out):
        kw, kb, ke, key = jax.random.split(key, 4)
        stdv = 1.0 / math.sqrt(fo)
        w = jax.random.uniform(kw, (fi, fo), jnp.float32, -stdv, stdv)
        b = jax.random.uniform(kb, (fo,), jnp.float32, -stdv, stdv)
        emb = jax.random.normal(ke, (position_vocab_size, pos_dim), jnp.float32)
        params["layers"].append((w, b))
        params["pos_emb"].append(emb)
    return params


def pgcn_forward(params, adj, features, positions):
    """adj: (N, N) with adj[dst, src] = 1.0 if edge src -> dst."""
    n = adj.shape[0]
    n_pad = _round_up(max(n, LANE), LANE)
    tm = _pick_dst_tile(n_pad)                                  # dst-row tile
    tk = _largest_tile(n_pad, (2048, 1024, 512, 256, 128))      # src (reduction) tile
    row_tile = _largest_tile(n_pad, (1024, 512, 256, 128))      # XW row tile

    # A_hat built once, in (essentially) one fused pass, written bf16 directly.
    adj_f32 = adj.astype(jnp.float32)
    if n_pad != n:
        adj_f32 = jnp.zeros((n_pad, n_pad), jnp.float32).at[:n, :n].set(adj_f32)
    degs = jnp.sum(adj_f32, axis=1)                             # in-degree (A[dst,src])
    norm = jnp.where(degs > 0, jax.lax.rsqrt(degs), 0.0)
    a_hat_pad = (adj_f32 * norm[:, None] * norm[None, :]).astype(jnp.bfloat16)
    # TODO(synk): on v7x, a_hat_pad could be stored as fp8 (e4m3) to halve the
    # dominant HBM stream again; needs per-target dispatch + revalidation.

    pos_pad = jnp.zeros((n_pad,), jnp.int32).at[:n].set(positions.astype(jnp.int32))

    # h flows between layers in padded (n_pad, f_pad) bf16 form — no per-layer
    # slice / re-pad HBM round trips.  A_hat's zero padded rows/cols keep the
    # garbage in padded rows inert (never mixed into real rows).
    f_h = features.shape[1]
    f_h_pad = _round_up(f_h, LANE)
    h_pad = (jnp.zeros((n_pad, f_h_pad), jnp.float32)
             .at[:n, :f_h].set(features.astype(jnp.float32))
             .astype(jnp.bfloat16))

    num_layers_total = len(params["layers"])
    for idx in range(num_layers_total):
        w, b = params["layers"][idx]
        emb = params["pos_emb"][idx]
        f_in, f_out = w.shape
        pos_dim = emb.shape[1]
        assert f_in == f_h + pos_dim
        f_out_pad = _round_up(f_out, LANE)

        # Split W so the concat disappears: x @ W = h @ W_h + P @ W_p.
        w_h_pad = (jnp.zeros((f_h_pad, f_out_pad), jnp.float32)
                   .at[:f_h, :f_out].set(w[:f_h])
                   .astype(jnp.bfloat16))
        # P @ W_p has only `position_vocab_size` distinct rows: tiny matmul + gather.
        pw_small = (jnp.zeros((emb.shape[0], f_out_pad), jnp.float32)
                    .at[:, :f_out].set(emb @ w[f_h:])
                    .astype(jnp.bfloat16))
        pw_pad = jnp.take(pw_small, pos_pad, axis=0)            # (n_pad, f_out_pad) bf16

        b_pad = jnp.zeros((1, f_out_pad), jnp.float32).at[0, :f_out].set(b)

        last = idx == num_layers_total - 1
        h_pad = gcn_layer(h_pad, w_h_pad, pw_pad, b_pad, a_hat_pad,
                          apply_relu=not last,
                          out_dtype=jnp.float32 if last else jnp.bfloat16,
                          row_tile=row_tile, tm=tm, tk=tk)
        f_h, f_h_pad = f_out, f_out_pad

    # TODO(synk): dropout layers are omitted (inference-mode / deterministic run).
    return h_pad[:n, :f_h]


# ---------------------------------------------------------------------------
# Pure-JAX f32 reference (PyTorch semantics) for a sanity check
# ---------------------------------------------------------------------------
def pgcn_forward_ref(params, adj, features, positions):
    degs = jnp.sum(adj, axis=1)
    norm = jnp.where(degs > 0, degs ** -0.5, 0.0)[:, None].astype(jnp.float32)
    n_layers = len(params["layers"])
    h = features
    for idx in range(n_layers):
        w, b = params["layers"][idx]
        emb = params["pos_emb"][idx]
        x = jnp.concatenate([h, jnp.take(emb, positions, axis=0)], axis=1)
        hh = (x @ w) * norm
        hh = (adj @ hh) * norm + b[None, :]
        if idx < n_layers - 1:
            hh = jnp.maximum(hh, 0.0)
        h = hh
    return h


if __name__ == "__main__":
    key = jax.random.PRNGKey(0)

    # Small synthetic problem
    N = 16                 # number of graph nodes
    in_dim = 32
    hidden_dim = 32
    out_dim = 8
    pos_dim = 8
    num_layers = 2         # -> total of num_layers + 1 GCN layers
    position_vocab_size = 3

    k_feat, k_adj, k_pos, k_par = jax.random.split(key, 4)
    features = jax.random.normal(k_feat, (N, in_dim), jnp.float32)
    adj = (jax.random.uniform(k_adj, (N, N)) < 0.3).astype(jnp.float32)
    positions = jax.random.randint(k_pos, (N,), 0, position_vocab_size)

    params = init_pgcn_params(k_par, in_dim, hidden_dim, out_dim, pos_dim,
                              num_layers, position_vocab_size)

    out = pgcn_forward(params, adj, features, positions)
    out = jax.block_until_ready(out)

    ref = pgcn_forward_ref(params, adj, features, positions)
    assert out.shape == (N, out_dim)
    # bf16 adjacency / weights / activations (f32 accumulation) -> loosened tolerance
    assert jnp.allclose(out, ref, atol=4e-2, rtol=4e-2), "mismatch vs JAX reference"

    print("KERNEL_OK")
</pallas_src>

<mosaic_0001>
module attributes {stable_mosaic.version = 11 : i64} {
  func.func @_xw_kernel(%arg0: i32, %arg1: memref<128x128xbf16, #tpu.memory_space<vmem>>, %arg2: memref<128x128xbf16, #tpu.memory_space<vmem>>, %arg3: memref<128x128xbf16, #tpu.memory_space<vmem>>, %arg4: memref<128x128xbf16, #tpu.memory_space<vmem>>) attributes {dimension_semantics = [#tpu.dimension_semantics<parallel>], iteration_bounds = array<i64: 1>, scalar_prefetch = 0 : i64, scratch_operands = 0 : i64, tpu.core_type = #tpu.core_type<tc>, window_params = [{transform_indices = @transform_0, window_bounds = array<i64: 128, 128>}, {pipeline_mode = #tpu.pipeline_mode<synchronous>, transform_indices = @transform_1, window_bounds = array<i64: 128, 128>}, {transform_indices = @transform_2, window_bounds = array<i64: 128, 128>}, {transform_indices = @transform_3, window_bounds = array<i64: 128, 128>}]} {
    %c0 = arith.constant 0 : index
    %c0_0 = arith.constant 0 : index
    %0 = vector.load %arg1[%c0, %c0_0] : memref<128x128xbf16, #tpu.memory_space<vmem>>, vector<128x128xbf16>
    %c0_1 = arith.constant 0 : index
    %c0_2 = arith.constant 0 : index
    %1 = vector.load %arg2[%c0_1, %c0_2] : memref<128x128xbf16, #tpu.memory_space<vmem>>, vector<128x128xbf16>
    %cst = arith.constant dense<0.000000e+00> : vector<128x128xf32>
    %2 = tpu.matmul %0, %1, %cst {dimension_numbers = #tpu.dot_dimension_numbers<[1], [0], [0], [1], [0, 0, 1, 1], [], []>} : vector<128x128xbf16>, vector<128x128xbf16>, vector<128x128xf32> -> vector<128x128xf32>
    %c0_3 = arith.constant 0 : index
    %c0_4 = arith.constant 0 : index
    %3 = vector.load %arg3[%c0_3, %c0_4] : memref<128x128xbf16, #tpu.memory_space<vmem>>, vector<128x128xbf16>
    %4 = arith.extf %3 : vector<128x128xbf16> to vector<128x128xf32>
    %5 = arith.addf %2, %4 : vector<128x128xf32>
    %6 = arith.truncf %5 : vector<128x128xf32> to vector<128x128xbf16>
    %c0_5 = arith.constant 0 : index
    %c0_6 = arith.constant 0 : index
    %7 = vector.load %arg4[%c0_5, %c0_6] : memref<128x128xbf16, #tpu.memory_space<vmem>>, vector<128x128xbf16>
    tpu.vector_store %arg4[%c0_5, %c0_6], %6 {strides = array<i32>} : memref<128x128xbf16, #tpu.memory_space<vmem>>, vector<128x128xbf16>,
    return
  }
  func.func @transform_0(%arg0: i32) -> (i32, i32) {
    %c0_i32 = arith.constant 0 : i32
    %c0_i32_0 = arith.constant 0 : i32
    return %arg0, %c0_i32 : i32, i32
  }
  func.func @transform_1(%arg0: i32) -> (i32, i32) {
    %c0_i32 = arith.constant 0 : i32
    %c0_i32_0 = arith.constant 0 : i32
    %c0_i32_1 = arith.constant 0 : i32
    return %c0_i32, %c0_i32_0 : i32, i32
  }
  func.func @transform_2(%arg0: i32) -> (i32, i32) {
    %c0_i32 = arith.constant 0 : i32
    %c0_i32_0 = arith.constant 0 : i32
    return %arg0, %c0_i32 : i32, i32
  }
  func.func @transform_3(%arg0: i32) -> (i32, i32) {
    %c0_i32 = arith.constant 0 : i32
    %c0_i32_0 = arith.constant 0 : i32
    return %arg0, %c0_i32 : i32, i32
  }
}

</mosaic_0001>

<bundles_post_ra>
// kernel: tpu_custom_call.1
= control target key start
LH: loop header
LB: loop body
LE: loop exit
PB: predicated region body
PF: predicated region fallthrough
CT: control target
= control target key end

     0   :  { %8 = vsyncpa [#allocation3], 0  ;;  %s819_s0 = inlined_call_operand.hbm [shape: bf16[128,128], index: 0, kind: input, shape index: {}]   ;;  %s820_s1 = inlined_call_operand.hbm [shape: bf16[128,128], index: 1, kind: input, shape index: {}]   ;;  %s821_s2 = inlined_call_operand.hbm [shape: bf16[128,128], index: 2, kind: input, shape index: {}]   ;;  %s822_s3 = inlined_call_operand.hbm [shape: bf16[128,128], index: 3, kind: output, shape index: {}]  }
   0x1   :  { %9 = vsyncpa [#allocation6], 0 }
   0x2   :  { %10 = vsyncpa [#allocation4], 0  ;;  %s726_s12 = smov [#allocation5]   ;;  %s727_s14 = smov [#allocation2]  }
   0x3   :  { %s28_s13 = sshll.u32 %s726_s12, 4  ;;  %s16_s15 = sshll.u32 %s727_s14, 4  ;;  %s29_s13 = int_to_ptr.vmem [resolvable:$true] %s28_s13  ;;  %s752_s15 = int_to_ptr.vmem [resolvable:$true] %s16_s15 }
   0x4   :  { %s632_s18 = scalar_lea.hbm %s820_s1, 1024 }
   0x5   :  { %p633_p0 = scmp.ne.s32.totalorder %s820_s1, %s632_s18  ;;  %p636_p1 = scmp.lt.u32.totalorder %s632_s18, %s820_s1 }
   0x7   :  { %p638_p2 = pnand %p636_p1, %p633_p0 }
   0x9   :  { %641 = shalt.err (!%p638_p2)
}
   0xa   :  { %s642_s23 = scalar_lea.vmem %s29_s13, 1024  ;;  %p647_p4 = scmp.lt.s32.totalorder %s29_s13, %s29_s13 }
   0xb   :  { %p643_p3 = scmp.ne.s32.totalorder %s29_s13, %s642_s23  ;;  %p648_p5 = scmp.lt.s32.totalorder %s642_s23, %s642_s23 }
   0xd   :  { %p649_p6 = por %p648_p5, %p647_p4 }
   0xf   :  { %p650_p7 = pnand %p649_p6, %p643_p3 }
  0x11   :  { %653 = shalt.err (!%p650_p7)
}
  0x12   :  { %s728_s24 = smov 64   ;;  %s729_s25 = smov 4  }
  0x13   :  { %34 = dma.hbm_to_vmem [thread:$0]  %s820_s1, 1024, %s29_s13, [#allocation6], %s728_s24, %s728_s24, %s729_s25  }
  0x14   :  { %s654_s30 = scalar_lea.hbm %s819_s0, 1024 }
  0x15   :  { %p655_p8 = scmp.ne.s32.totalorder %s819_s0, %s654_s30  ;;  %p658_p9 = scmp.lt.u32.totalorder %s654_s30, %s819_s0 }
  0x17   :  { %p660_p10 = pnand %p658_p9, %p655_p8 }
  0x19   :  { %663 = shalt.err (!%p660_p10)
}
  0x1a   :  { %s664_s8 = scalar_lea.vmem %s752_s15, 1024  ;;  %p669_p12 = scmp.lt.s32.totalorder %s752_s15, %s752_s15 }
  0x1b   :  { %p665_p11 = scmp.ne.s32.totalorder %s752_s15, %s664_s8  ;;  %p670_p13 = scmp.lt.s32.totalorder %s664_s8, %s664_s8 }
  0x1d   :  { %p671_p0 = por %p670_p13, %p669_p12 }
  0x1f   :  { %p672_p1 = pnand %p671_p0, %p665_p11 }
  0x21   :  { %675 = shalt.err (!%p672_p1)
}
  0x22   :  { %22 = dma.hbm_to_vmem [thread:$0]  %s819_s0, 1024, %s752_s15, [#allocation3], %s728_s24, %s728_s24, %s729_s25  }
  0x23   :  { %s730_s10 = smov [#allocation7]   ;;  %s676_s14 = scalar_lea.hbm %s821_s2, 1024 }
  0x24   :  { %s40_s11 = sshll.u32 %s730_s10, 4  ;;  %p677_p2 = scmp.ne.s32.totalorder %s821_s2, %s676_s14  ;;  %s41_s11 = int_to_ptr.vmem [resolvable:$true] %s40_s11 }
  0x25   :  { %p680_p3 = scmp.lt.u32.totalorder %s676_s14, %s821_s2 }
  0x27   :  { %p682_p4 = pnand %p680_p3, %p677_p2 }
  0x29   :  { %685 = shalt.err (!%p682_p4)
}
  0x2a   :  { %s686_s20 = scalar_lea.vmem %s41_s11, 1024  ;;  %p691_p6 = scmp.lt.s32.totalorder %s41_s11, %s41_s11 }
  0x2b   :  { %p687_p5 = scmp.ne.s32.totalorder %s41_s11, %s686_s20  ;;  %p692_p7 = scmp.lt.s32.totalorder %s686_s20, %s686_s20 }
  0x2d   :  { %p693_p8 = por %p692_p7, %p691_p6 }
  0x2f   :  { %p694_p9 = pnand %p693_p8, %p687_p5 }
  0x31   :  { %697 = shalt.err (!%p694_p9)
}
  0x32   :  { %46 = dma.hbm_to_vmem [thread:$0]  %s821_s2, 1024, %s41_s11, [#allocation6], %s728_s24, %s728_s24, %s729_s25  }
  0x33   :  { %720 = dma.done.wait [#allocation3], 1024  }
  0x34   :  { %721 = vsyncadd [#allocation3], 4294966272 }
  0x35   :  { %722 = dma.done.wait [#allocation6], 2048  }
  0x36   :  { %723 = vsyncadd [#allocation6], 4294965248  ;;  %v616_v0 = vld [vmem:[#allocation5] sm:$0xff]   ;;  %v617_v1 = vld [vmem:[#allocation5 + $0x8] sm:$0xff]   ;;  %s731_s2 = smov [#allocation8]  }
  0x37   :  { %562 = vmatprep.subr.bf16.mxu0 %v616_v0  ;;  %594 = vmatprep.subr.bf16.mxu1 %v616_v0  ;;  %v618_v2 = vld [vmem:[#allocation5 + $0x10] sm:$0xff]   ;;  %v619_v3 = vld [vmem:[#allocation5 + $0x18] sm:$0xff]   ;;  %v624_v4 = vld [vmem:[#allocation2] sm:$0xff]   ;;  %s399_s21 = sshll.u32 %s731_s2, 4  ;;  %s400_s21 = int_to_ptr.vmem [resolvable:$true] %s399_s21 }
  0x38   :  { %563 = vmatpush3.bf16.msra.mxu0 %v616_v0  ;;  %602 = vmatpush3.bf16.msra.mxu1 %v616_v0  ;;  %v625_v5 = vld [vmem:[#allocation2 + $0x20] sm:$0xff]   ;;  %v621_v7 = vld [vmem:[#allocation5 + $0x28] sm:$0xff]   ;;  %v622_v8 = vld [vmem:[#allocation5 + $0x30] sm:$0xff]   ;;  %s698_s22 = scalar_lea.vmem %s400_s21, 1024  ;;  %p703_p11 = scmp.lt.s32.totalorder %s400_s21, %s400_s21 }
  0x39   :  { %564 = vmatprep.subr.bf16.mxu0 %v617_v1  ;;  %595 = vmatprep.subr.bf16.mxu1 %v617_v1  ;;  %v620_v6 = vld [vmem:[#allocation5 + $0x20] sm:$0xff]   ;;  %v623_v9 = vld [vmem:[#allocation5 + $0x38] sm:$0xff]   ;;  %v626_v10 = vld [vmem:[#allocation2 + $0x8] sm:$0xff]   ;;  %p699_p10 = scmp.ne.s32.totalorder %s400_s21, %s698_s22  ;;  %p704_p12 = scmp.lt.s32.totalorder %s698_s22, %s698_s22 }
  0x3a   :  { %578 = vmatprep.mubr.bf16.mxu0 %v624_v4  ;;  %586 = vmatprep.mubr.bf16.mxu1 %v625_v5  ;;  %v627_v11 = vld [vmem:[#allocation2 + $0x28] sm:$0xff]   ;;  %v628_v12 = vld [vmem:[#allocation2 + $0x10] sm:$0xff]   ;;  %v630_v14 = vld [vmem:[#allocation2 + $0x18] sm:$0xff]  }
  0x3b   :  { %v629_v13 = vld [vmem:[#allocation2 + $0x30] sm:$0xff]   ;;  %v631_v15 = vld [vmem:[#allocation2 + $0x38] sm:$0xff]   ;;  %v532_v16 = vld [vmem:[#allocation7 + $0x8] sm:$0xff]   ;;  %p705_p13 = por %p704_p12, %p703_p11 }
  0x3c   :  { %565 = vmatpush3.bf16.msra.mxu0 %v617_v1  ;;  %603 = vmatpush3.bf16.msra.mxu1 %v617_v1  ;;  %v536_v17 = vld [vmem:[#allocation7 + $0x28] sm:$0xff]   ;;  %v461_v18 = vld [vmem:[#allocation7] sm:$0xff]   ;;  %v466_v20 = vunpack.c.l.bf16 %v532_v16  ;;  %v467_v22 = vunpack.c.h.bf16 %v532_v16  ;;  %v534_v44 = vld [vmem:[#allocation7 + $0x18] sm:$0xff]  }
  0x3d   :  { %566 = vmatprep.subr.bf16.mxu0 %v618_v2  ;;  %596 = vmatprep.subr.bf16.mxu1 %v618_v2  ;;  %v535_v19 = vld [vmem:[#allocation7 + $0x20] sm:$0xff]   ;;  %v482_v21 = vunpack.c.l.bf16 %v536_v17  ;;  %v483_v23 = vunpack.c.h.bf16 %v536_v17  ;;  %v462_v26 = vunpack.c.l.bf16 %v461_v18  ;;  %v463_v28 = vunpack.c.h.bf16 %v461_v18  ;;  %v538_v45 = vld [vmem:[#allocation7 + $0x38] sm:$0xff]   ;;  %v533_v48 = vld [vmem:[#allocation7 + $0x10] sm:$0xff]   ;;  %p706_p0 = pnand %p705_p13, %p699_p10 }
  0x3e   :  { %v478_v27 = vunpack.c.l.bf16 %v535_v19  ;;  %v479_v29 = vunpack.c.h.bf16 %v535_v19  ;;  %v537_v49 = vld [vmem:[#allocation7 + $0x30] sm:$0xff]   ;;  %v474_v52 = vunpack.c.l.bf16 %v534_v44  ;;  %v490_v53 = vunpack.c.l.bf16 %v538_v45 }
  0x3f   :  { %v475_v54 = vunpack.c.h.bf16 %v534_v44  ;;  %v491_v55 = vunpack.c.h.bf16 %v538_v45  ;;  %v470_v58 = vunpack.c.l.bf16 %v533_v48  ;;  %v486_v59 = vunpack.c.l.bf16 %v537_v49 }
  0x40   :  { %567 = vmatpush3.bf16.msra.mxu0 %v618_v2  ;;  %604 = vmatpush3.bf16.msra.mxu1 %v618_v2  ;;  %v471_v60 = vunpack.c.h.bf16 %v533_v48  ;;  %v487_v61 = vunpack.c.h.bf16 %v537_v49 }
  0x41   :  { %568 = vmatprep.subr.bf16.mxu0 %v619_v3  ;;  %597 = vmatprep.subr.bf16.mxu1 %v619_v3 }
  0x44   :  { %569 = vmatpush3.bf16.msra.mxu0 %v619_v3  ;;  %605 = vmatpush3.bf16.msra.mxu1 %v619_v3 }
  0x45   :  { %570 = vmatprep.subr.bf16.mxu0 %v620_v6  ;;  %598 = vmatprep.subr.bf16.mxu1 %v620_v6 }
  0x48   :  { %571 = vmatpush3.bf16.msra.mxu0 %v620_v6  ;;  %606 = vmatpush3.bf16.msra.mxu1 %v620_v6 }
  0x49   :  { %572 = vmatprep.subr.bf16.mxu0 %v621_v7  ;;  %599 = vmatprep.subr.bf16.mxu1 %v621_v7 }
  0x4c   :  { %573 = vmatpush3.bf16.msra.mxu0 %v621_v7  ;;  %607 = vmatpush3.bf16.msra.mxu1 %v621_v7 }
  0x4d   :  { %574 = vmatprep.subr.bf16.mxu0 %v622_v8  ;;  %600 = vmatprep.subr.bf16.mxu1 %v622_v8 }
  0x50   :  { %575 = vmatpush3.bf16.msra.mxu0 %v622_v8  ;;  %608 = vmatpush3.bf16.msra.mxu1 %v622_v8 }
  0x51   :  { %576 = vmatprep.subr.bf16.mxu0 %v623_v9  ;;  %601 = vmatprep.subr.bf16.mxu1 %v623_v9 }
  0x54   :  { %577 = vmatpush3.bf16.msra.mxu0 %v623_v9  ;;  %609 = vmatpush3.bf16.msra.mxu1 %v623_v9 }
  0x57   :  { %579 = vmatmul.mubr.bf16.vlgmr.msra.gmra.mrb[0].mxu0 %v626_v10  ;;  %587 = vmatmul.mubr.bf16.vlgmr.msra.gmra.mrb[0].mxu1 %v627_v11 }
  0x58   :  { %582 = vmatprep.mubr.bf16.mxu0 %v628_v12  ;;  %590 = vmatprep.mubr.bf16.mxu1 %v629_v13 }
  0x5f   :  { %583 = vmatmul.mubr.bf16.gmra.mrb[4].mxu0 %v630_v14  ;;  %591 = vmatmul.mubr.bf16.gmra.mrb[4].mxu1 %v631_v15 }
 0x12a   :  { %v580_v24 = vpop.f32.mrb[0].mxu0  ;;  %v588_v25 = vpop.f32.mrb[0].mxu1 }
 0x12b   :  { %v251_v30 = vpop.f32.mrb[1].mxu0  ;;  %v283_v31 = vpop.f32.mrb[1].mxu1  ;;  %v260_v34 = vadd.f32 %v580_v24, %v466_v20  ;;  %v292_v35 = vadd.f32 %v588_v25, %v482_v21 }
 0x12c   :  { %v581_v32 = vpop.f32.mrb[2].mxu0  ;;  %v589_v33 = vpop.f32.mrb[2].mxu1  ;;  %v252_v40 = vadd.f32 %v462_v26, %v251_v30  ;;  %v284_v41 = vadd.f32 %v478_v27, %v283_v31 }
 0x12d   :  { %v263_v36 = vadd.f32 %v581_v32, %v467_v22  ;;  %v295_v37 = vadd.f32 %v589_v33, %v483_v23  ;;  %v254_v38 = vpop.f32.mrb[3].mxu0  ;;  %v286_v39 = vpop.f32.mrb[3].mxu1 }
 0x12e   :  { %v255_v42 = vadd.f32 %v463_v28, %v254_v38  ;;  %v287_v43 = vadd.f32 %v479_v29, %v286_v39 }
 0x12f   :  { %v500_v46 = vpack.c.bf16 %v263_v36, %v260_v34  ;;  %v520_v47 = vpack.c.bf16 %v295_v37, %v292_v35 }
 0x130   :  { %v495_v50 = vpack.c.bf16 %v255_v42, %v252_v40  ;;  %v515_v51 = vpack.c.bf16 %v287_v43, %v284_v41 }
 0x131   :  { %539 = vst [vmem:[#allocation8 + $0x8] sm:$0xff] %v500_v46   ;;  %543 = vst [vmem:[#allocation8 + $0x28] sm:$0xff] %v520_v47  }
 0x132   :  { %496 = vst [vmem:[#allocation8] sm:$0xff] %v495_v50   ;;  %542 = vst [vmem:[#allocation8 + $0x20] sm:$0xff] %v515_v51   ;;  %v584_v56 = vpop.f32.mrb[4].mxu0  ;;  %v592_v57 = vpop.f32.mrb[4].mxu1 }
 0x133   :  { %v267_v62 = vpop.f32.mrb[5].mxu0  ;;  %v299_v63 = vpop.f32.mrb[5].mxu1  ;;  %v276_v2 = vadd.f32 %v584_v56, %v474_v52  ;;  %v308_v3 = vadd.f32 %v592_v57, %v490_v53 }
 0x134   :  { %v585_v0 = vpop.f32.mrb[6].mxu0  ;;  %v593_v1 = vpop.f32.mrb[6].mxu1  ;;  %v268_v8 = vadd.f32 %v470_v58, %v267_v62  ;;  %v300_v9 = vadd.f32 %v486_v59, %v299_v63 }
 0x135   :  { %v279_v4 = vadd.f32 %v585_v0, %v475_v54  ;;  %v311_v5 = vadd.f32 %v593_v1, %v491_v55  ;;  %v270_v6 = vpop.f32.mrb[7].mxu0  ;;  %v302_v7 = vpop.f32.mrb[7].mxu1 }
 0x136   :  { %v271_v10 = vadd.f32 %v471_v60, %v270_v6  ;;  %v303_v11 = vadd.f32 %v487_v61, %v302_v7 }
 0x137   :  { %v510_v12 = vpack.c.bf16 %v279_v4, %v276_v2  ;;  %v530_v13 = vpack.c.bf16 %v311_v5, %v308_v3 }
 0x138   :  { %v505_v14 = vpack.c.bf16 %v271_v10, %v268_v8  ;;  %v525_v15 = vpack.c.bf16 %v303_v11, %v300_v9 }
 0x139   :  { %541 = vst [vmem:[#allocation8 + $0x18] sm:$0xff] %v510_v12   ;;  %545 = vst [vmem:[#allocation8 + $0x38] sm:$0xff] %v530_v13  }
 0x13a   :  { %540 = vst [vmem:[#allocation8 + $0x10] sm:$0xff] %v505_v14   ;;  %544 = vst [vmem:[#allocation8 + $0x30] sm:$0xff] %v525_v15  }
 0x13b   :  { %709 = shalt.err (!%p706_p0)
}
 0x13c   :  { %s710_s27 = scalar_lea.hbm %s822_s3, 1024 }
 0x13d   :  { %p711_p1 = scmp.ne.s32.totalorder %s822_s3, %s710_s27  ;;  %p714_p2 = scmp.lt.u32.totalorder %s710_s27, %s822_s3 }
 0x13f   :  { %p716_p3 = pnand %p714_p2, %p711_p1 }
 0x141   :  { %719 = shalt.err (!%p716_p3)
}
 0x142   :  { %405 = dma.vmem_to_hbm [thread:$0]  %s400_s21, 1024, %s822_s3, [#allocation4], %s728_s24, %s728_s24, %s729_s25  }
 0x143   :  { %724 = dma.done.wait [#allocation4], 1024  }
 0x144   :  { %725 = vsyncadd [#allocation4], 4294966272 }
 0x145   :  { %409 = vsyncpa [#allocation3], 1 }
 0x146   :  { %410 = vsyncpa [#allocation6], 1 }
 0x147   :  { %411 = vsyncpa [#allocation4], 1 }

</bundles_post_ra>
